<compile_context>
chip_gen: v7x
topology: tpu7x:2x2x1
jax: 0.10.0
libtpu: 0.0.40
codegen_flags: <defaults>
</compile_context>

<pallas_src>
import functools

import jax
import jax.numpy as jnp
from jax.experimental import pallas as pl
from jax.experimental.pallas import tpu as pltpu


def _n_transe_kernel(e1_ref, r_ref, e2_ref, out_ref, *, p):
    # Elementwise add/sub + p-norm reduction over the embedding dim.
    # Inputs may be bf16; accumulate in f32.
    diff = (e1_ref[...].astype(jnp.float32)
            + r_ref[...].astype(jnp.float32)
            - e2_ref[...].astype(jnp.float32))
    if p == 1:
        norm = jnp.sum(jnp.abs(diff), axis=1)                      # (block_b,)
    elif p == 2:
        # NOTE: if the XLU lane-reduce ever binds (tiny D, huge block_b on
        # v7x), swap this for jnp.dot(diff*diff, ones((D,1))) to push the
        # reduction onto the idle MXU.  HBM-bound in practice, so not needed.
        norm = jnp.sqrt(jnp.sum(diff * diff, axis=1))              # (block_b,)
    else:
        norm = jnp.power(jnp.sum(jnp.power(jnp.abs(diff), float(p)), axis=1),
                         1.0 / p)
    # Lane-dense store: one (1, block_b) row per grid step (unmasked vst when
    # block_b is a multiple of 128).  Sublane->lane relayout uses the XLU.
    out_ref[...] = (-norm)[None, :]


def _vmem_capacity_bytes():
    try:
        return int(pltpu.get_tpu_info().vmem_capacity_bytes)
    except Exception:
        # Generation-safe fallback: v7x has only 64 MiB per TensorCore.
        return 64 << 20


def _pick_block_b(B, D, itemsize):
    """Batch tile: as big as VMEM allows, lane-aligned, with enough grid steps."""
    vmem_cap = _vmem_capacity_bytes()
    budget = min(int(vmem_cap * 0.6), 48 << 20)      # double-buffer budget
    per_row = 2 * 3 * D * itemsize                   # 2 bufs x 3 inputs / row
    quantum = 8 if itemsize >= 4 else 16             # sublane packing

    block_b = min(max(budget // per_row, quantum), 8192)
    # Keep >= ~8 grid steps on large batches so megacore sharding + the
    # double-buffered pipeline have work, as long as tiles stay >= 512 rows.
    if B >= 8 * 512:
        block_b = min(block_b, pl.cdiv(B, 8))
    # Multiples of 128 keep the lane-dense output store unmasked and the input
    # sublane count aligned; fall back to the sublane quantum if tiny.
    if block_b >= 128:
        block_b = (block_b // 128) * 128
    else:
        block_b = max((block_b // quantum) * quantum, quantum)
    # Never exceed the batch itself (one full-array block for small B).
    if block_b > B:
        block_b = B
    return int(block_b)


def n_transe_forward(e1, r, e2, *, p=2, block_b=None):
    """pred = -||e1 + r - e2||_p along dim=1.  e1, r, e2: (B, D) -> (B,) f32."""
    B, D = e1.shape
    itemsize = jnp.dtype(e1.dtype).itemsize
    if block_b is None:
        block_b = _pick_block_b(B, D, itemsize)
    block_b = int(block_b)

    # Ragged batches: no jnp.pad (that would be a full extra HBM pass).  The
    # last input block is partial; its garbage tail rows only produce output
    # lanes >= B, which are sliced off below.
    num_tiles = pl.cdiv(B, block_b)

    # Scoped-VMEM budget sized from the real double-buffer footprint
    # (inputs + lane-padded (8, block_b) output tiles).
    vmem_cap = _vmem_capacity_bytes()
    footprint = 2 * 3 * block_b * D * itemsize + 2 * 8 * block_b * 4
    vmem_limit = int(min(max(footprint + (4 << 20), 32 << 20),
                         vmem_cap - (8 << 20)))

    cost = pl.CostEstimate(
        flops=4 * B * D,                       # add + sub + |.|^p-ish + reduce
        transcendentals=(0 if p == 1 else B),
        bytes_accessed=3 * B * D * itemsize + 4 * num_tiles * block_b,
    )

    kernel = functools.partial(_n_transe_kernel, p=p)
    out = pl.pallas_call(
        kernel,
        out_shape=jax.ShapeDtypeStruct((num_tiles, block_b), jnp.float32),
        grid_spec=pltpu.PrefetchScalarGridSpec(
            num_scalar_prefetch=0,
            grid=(num_tiles,),
            in_specs=[
                pl.BlockSpec((block_b, D), lambda i: (i, 0)),
                pl.BlockSpec((block_b, D), lambda i: (i, 0)),
                pl.BlockSpec((block_b, D), lambda i: (i, 0)),
            ],
            out_specs=pl.BlockSpec((1, block_b), lambda i: (i, 0)),
        ),
        compiler_params=pltpu.CompilerParams(
            dimension_semantics=("parallel",),   # shards batch tiles across TCs
            vmem_limit_bytes=vmem_limit,
        ),
        cost_estimate=cost,
    )(e1, r, e2)
    # Flatten tile-major rows back to a (B,) vector; drop ragged-tail garbage.
    return out.reshape(-1)[:B]


if __name__ == "__main__":
    key = jax.random.PRNGKey(0)
    k1, k2, k3 = jax.random.split(key, 3)

    B, D = 8, 128          # small batch of triples, embedding dim 128
    p_norm = 2             # module's self.p (norm order)

    e1 = jax.random.normal(k1, (B, D), dtype=jnp.float32)
    r = jax.random.normal(k2, (B, D), dtype=jnp.float32)
    e2 = jax.random.normal(k3, (B, D), dtype=jnp.float32)

    pred = n_transe_forward(e1, r, e2, p=p_norm)
    jax.block_until_ready(pred)
    ref = -jnp.linalg.norm(e1 + r - e2, ord=p_norm, axis=1)
    assert pred.shape == (B,)
    assert jnp.allclose(pred, ref, atol=1e-5, rtol=1e-5)

    # Ragged batch with an explicit small tile: exercises the multi-step grid
    # and the partial (garbage-tail) final input block — no jnp.pad anywhere.
    B2 = 12
    e1b = jax.random.normal(k1, (B2, D), dtype=jnp.float32)
    rb = jax.random.normal(k2, (B2, D), dtype=jnp.float32)
    e2b = jax.random.normal(k3, (B2, D), dtype=jnp.float32)
    pred2 = n_transe_forward(e1b, rb, e2b, p=p_norm, block_b=8)
    jax.block_until_ready(pred2)
    ref2 = -jnp.linalg.norm(e1b + rb - e2b, ord=p_norm, axis=1)
    assert pred2.shape == (B2,)
    assert jnp.allclose(pred2, ref2, atol=1e-5, rtol=1e-5)

    # bf16 inputs (halves HBM traffic; f32 accumulation in-kernel), p=1 path.
    e1h, rh, e2h = (t.astype(jnp.bfloat16) for t in (e1, r, e2))
    pred3 = n_transe_forward(e1h, rh, e2h, p=1)
    jax.block_until_ready(pred3)
    ref3 = -jnp.sum(jnp.abs(e1h.astype(jnp.float32) + rh.astype(jnp.float32)
                            - e2h.astype(jnp.float32)), axis=1)
    assert pred3.shape == (B,)
    assert jnp.allclose(pred3, ref3, atol=1e-3, rtol=1e-3)

    # TODO(synk): N_TransE.loss() (margin/regularizer) is not part of forward()
    # and is left to plain JAX outside the kernel.
    print("KERNEL_OK")
</pallas_src>

<mosaic_0001>
module attributes {stable_mosaic.version = 11 : i64} {
  func.func @_n_transe_kernel(%arg0: i32, %arg1: memref<8x128xf32, #tpu.memory_space<vmem>>, %arg2: memref<8x128xf32, #tpu.memory_space<vmem>>, %arg3: memref<8x128xf32, #tpu.memory_space<vmem>>, %arg4: memref<1x8xf32, #tpu.memory_space<vmem>>) attributes {dimension_semantics = [#tpu.dimension_semantics<parallel>], iteration_bounds = array<i64: 1>, scalar_prefetch = 0 : i64, scratch_operands = 0 : i64, tpu.core_type = #tpu.core_type<tc>, window_params = [{transform_indices = @transform_0, window_bounds = array<i64: 8, 128>}, {transform_indices = @transform_1, window_bounds = array<i64: 8, 128>}, {transform_indices = @transform_2, window_bounds = array<i64: 8, 128>}, {transform_indices = @transform_3, window_bounds = array<i64: 1, 8>}]} {
    %c0 = arith.constant 0 : index
    %c0_0 = arith.constant 0 : index
    %0 = vector.load %arg1[%c0, %c0_0] : memref<8x128xf32, #tpu.memory_space<vmem>>, vector<8x128xf32>
    %c0_1 = arith.constant 0 : index
    %c0_2 = arith.constant 0 : index
    %1 = vector.load %arg2[%c0_1, %c0_2] : memref<8x128xf32, #tpu.memory_space<vmem>>, vector<8x128xf32>
    %2 = arith.addf %0, %1 : vector<8x128xf32>
    %c0_3 = arith.constant 0 : index
    %c0_4 = arith.constant 0 : index
    %3 = vector.load %arg3[%c0_3, %c0_4] : memref<8x128xf32, #tpu.memory_space<vmem>>, vector<8x128xf32>
    %4 = arith.subf %2, %3 : vector<8x128xf32>
    %5 = arith.mulf %4, %4 : vector<8x128xf32>
    %cst = arith.constant dense<0.000000e+00> : vector<8xf32>
    %6 = vector.multi_reduction <add>, %5, %cst [1] : vector<8x128xf32> to vector<8xf32>
    %7 = math.sqrt %6 : vector<8xf32>
    %cst_5 = arith.constant 0.000000e+00 : f32
    %8 = vector.broadcast %cst_5 : f32 to vector<8xf32>
    %9 = arith.subf %8, %7 : vector<8xf32>
    %10 = vector.shape_cast %9 : vector<8xf32> to vector<1x8xf32>
    %c0_6 = arith.constant 0 : index
    %c0_7 = arith.constant 0 : index
    %11 = vector.load %arg4[%c0_6, %c0_7] : memref<1x8xf32, #tpu.memory_space<vmem>>, vector<1x8xf32>
    tpu.vector_store %arg4[%c0_6, %c0_7], %10 {strides = array<i32>} : memref<1x8xf32, #tpu.memory_space<vmem>>, vector<1x8xf32>,
    return
  }
  func.func @transform_0(%arg0: i32) -> (i32, i32) {
    %c0_i32 = arith.constant 0 : i32
    %c0_i32_0 = arith.constant 0 : i32
    return %arg0, %c0_i32 : i32, i32
  }
  func.func @transform_1(%arg0: i32) -> (i32, i32) {
    %c0_i32 = arith.constant 0 : i32
    %c0_i32_0 = arith.constant 0 : i32
    return %arg0, %c0_i32 : i32, i32
  }
  func.func @transform_2(%arg0: i32) -> (i32, i32) {
    %c0_i32 = arith.constant 0 : i32
    %c0_i32_0 = arith.constant 0 : i32
    return %arg0, %c0_i32 : i32, i32
  }
  func.func @transform_3(%arg0: i32) -> (i32, i32) {
    %c0_i32 = arith.constant 0 : i32
    %c0_i32_0 = arith.constant 0 : i32
    return %arg0, %c0_i32 : i32, i32
  }
}

</mosaic_0001>

<bundles_post_ra>
// kernel: tpu_custom_call.1
= control target key start
LH: loop header
LB: loop body
LE: loop exit
PB: predicated region body
PF: predicated region fallthrough
CT: control target
= control target key end

     0   :  { %8 = vsyncpa [#allocation3], 0  ;;  %s264_s0 = inlined_call_operand.hbm [shape: f32[8,128], index: 0, kind: input, shape index: {}]   ;;  %s265_s1 = inlined_call_operand.hbm [shape: f32[8,128], index: 1, kind: input, shape index: {}]   ;;  %s266_s2 = inlined_call_operand.hbm [shape: f32[8,128], index: 2, kind: input, shape index: {}]   ;;  %s267_s3 = inlined_call_operand.hbm [shape: f32[1,8], index: 3, kind: output, shape index: {}]  }
   0x1   :  { %9 = vsyncpa [#allocation6], 0 }
   0x2   :  { %10 = vsyncpa [#allocation4], 0  ;;  %s192_s12 = smov [#allocation5]   ;;  %s193_s14 = smov [#allocation2]  }
   0x3   :  { %s27_s13 = sshll.u32 %s192_s12, 4  ;;  %s17_s15 = sshll.u32 %s193_s14, 4  ;;  %s28_s13 = int_to_ptr.vmem [resolvable:$true] %s27_s13  ;;  %s18_s15 = int_to_ptr.vmem [resolvable:$true] %s17_s15 }
   0x4   :  { %s98_s18 = scalar_lea.hbm %s265_s1, 128 }
   0x5   :  { %p99_p0 = scmp.ne.s32.totalorder %s265_s1, %s98_s18  ;;  %p102_p1 = scmp.lt.u32.totalorder %s98_s18, %s265_s1 }
   0x7   :  { %p104_p2 = pnand %p102_p1, %p99_p0 }
   0x9   :  { %107 = shalt.err (!%p104_p2)
}
   0xa   :  { %s108_s23 = scalar_lea.vmem %s28_s13, 128  ;;  %p113_p4 = scmp.lt.s32.totalorder %s28_s13, %s28_s13 }
   0xb   :  { %p109_p3 = scmp.ne.s32.totalorder %s28_s13, %s108_s23  ;;  %p114_p5 = scmp.lt.s32.totalorder %s108_s23, %s108_s23 }
   0xd   :  { %p115_p6 = por %p114_p5, %p113_p4 }
   0xf   :  { %p116_p7 = pnand %p115_p6, %p109_p3 }
  0x11   :  { %119 = shalt.err (!%p116_p7)
}
  0x12   :  { %30 = dma.hbm_to_vmem [thread:$0]  %s265_s1, 128, %s28_s13, [#allocation6]  }
  0x13   :  { %s120_s28 = scalar_lea.hbm %s264_s0, 128 }
  0x14   :  { %p121_p8 = scmp.ne.s32.totalorder %s264_s0, %s120_s28  ;;  %p124_p9 = scmp.lt.u32.totalorder %s120_s28, %s264_s0 }
  0x16   :  { %p126_p10 = pnand %p124_p9, %p121_p8 }
  0x18   :  { %129 = shalt.err (!%p126_p10)
}
  0x19   :  { %s130_s6 = scalar_lea.vmem %s18_s15, 128  ;;  %p135_p12 = scmp.lt.s32.totalorder %s18_s15, %s18_s15 }
  0x1a   :  { %p131_p11 = scmp.ne.s32.totalorder %s18_s15, %s130_s6  ;;  %p136_p13 = scmp.lt.s32.totalorder %s130_s6, %s130_s6 }
  0x1c   :  { %p137_p0 = por %p136_p13, %p135_p12 }
  0x1e   :  { %p138_p1 = pnand %p137_p0, %p131_p11 }
  0x20   :  { %141 = shalt.err (!%p138_p1)
}
  0x21   :  { %20 = dma.hbm_to_vmem [thread:$0]  %s264_s0, 128, %s18_s15, [#allocation3]  }
  0x22   :  { %s194_s8 = smov [#allocation7]   ;;  %s142_s12 = scalar_lea.hbm %s266_s2, 128 }
  0x23   :  { %s37_s9 = sshll.u32 %s194_s8, 4  ;;  %p143_p2 = scmp.ne.s32.totalorder %s266_s2, %s142_s12  ;;  %s38_s9 = int_to_ptr.vmem [resolvable:$true] %s37_s9 }
  0x24   :  { %p146_p3 = scmp.lt.u32.totalorder %s142_s12, %s266_s2 }
  0x26   :  { %p148_p4 = pnand %p146_p3, %p143_p2 }
  0x28   :  { %151 = shalt.err (!%p148_p4)
}
  0x29   :  { %s152_s18 = scalar_lea.vmem %s38_s9, 128  ;;  %p157_p6 = scmp.lt.s32.totalorder %s38_s9, %s38_s9 }
  0x2a   :  { %p153_p5 = scmp.ne.s32.totalorder %s38_s9, %s152_s18  ;;  %p158_p7 = scmp.lt.s32.totalorder %s152_s18, %s152_s18 }
  0x2c   :  { %p159_p8 = por %p158_p7, %p157_p6 }
  0x2e   :  { %p160_p9 = pnand %p159_p8, %p153_p5 }
  0x30   :  { %163 = shalt.err (!%p160_p9)
}
  0x31   :  { %40 = dma.hbm_to_vmem [thread:$0]  %s266_s2, 128, %s38_s9, [#allocation6]  }
  0x32   :  { %186 = dma.done.wait [#allocation3], 128  }
  0x33   :  { %187 = vsyncadd [#allocation3], 4294967168 }
  0x34   :  { %188 = dma.done.wait [#allocation6], 256  }
  0x35   :  { %189 = vsyncadd [#allocation6], 4294967040  ;;  %v50_v0 = vld [vmem:[#allocation2] sm:$0xff]  ;;  %v51_v1 = vld [vmem:[#allocation5] sm:$0xff]  ;;  %v67_v7 = vlaneseq  ;;  %s195_s2 = smov [#allocation8]   ;;  %vm74_vm2 = vcmask 57344  }
  0x36   :  { %v53_v2 = vld [vmem:[#allocation7] sm:$0xff]  ;;  %v52_v3 = vadd.f32 %v51_v1, %v50_v0  ;;  %s82_s19 = sshll.u32 %s195_s2, 4  ;;  %s83_s19 = int_to_ptr.vmem [resolvable:$true] %s82_s19 }
  0x37   :  { %v68_v8 = vand.u32 127, %v67_v7  ;;  %v70_v9 = vshrl.u32 %v67_v7, 7  ;;  %s164_s20 = scalar_lea.vmem %s83_s19, 16  ;;  %s168_s21 = scalar_lea.vmem %s83_s19, 32 }
  0x38   :  { %v54_v4 = vsub.f32 %v52_v3, %v53_v2  ;;  %p165_p10 = scmp.ne.s32.totalorder %s83_s19, %s164_s20  ;;  %p169_p11 = scmp.lt.s32.totalorder %s83_s19, %s83_s19 }
  0x39   :  { %v71_v14 = vsub.s32 %v68_v8, %v70_v9  ;;  %p170_p12 = scmp.lt.s32.totalorder %s168_s21, %s164_s20 }
  0x3a   :  { %v55_v5 = vmul.f32 %v54_v4, %v54_v4 }
  0x3b   :  { %p171_p13 = por %p170_p12, %p169_p11 }
  0x3c   :  { %56 = vadd.xlane.f32.xlu0 %v55_v5 }
  0x3d   :  { %p172_p0 = pnand %p171_p13, %p165_p10 }
  0xc9   :  { %v57_v6 = vpop.xlane.xlu0 %56 }
  0xca   :  { %96 = vrsqrt.f32 %v57_v6  ;;  %vm60_vm0 = vcmp.eq.f32.partialorder %v57_v6, inf  ;;  %v63_v12 = vand.u32 2147483648, %v57_v6  ;;  %vm62_vm1 = vcmp.eq.f32.partialorder %v57_v6, 0.0 }
  0xd4   :  { %v97_v10 = vpop.eup %96 }
  0xd5   :  { %v59_v11 = vmul.f32 %v97_v10, %v57_v6 }
  0xd7   :  { %v61_v13 = vsel %vm60_vm0, %v57_v6, %v59_v11 }
  0xd8   :  { %v64_v15 = vsel %vm62_vm1, %v63_v12, %v61_v13 }
  0xd9   :  { %v65_v16 = vsub.f32 0.0, %v64_v15 }
  0xdb   :  { %v72_v17 = vrot.slane %v65_v16, %v71_v14 }
  0xdd   :  { %75 = vst.msk [vmem:[#allocation8] sm:$0x1] %vm74_vm2, %v72_v17 }
  0xde   :  { %175 = shalt.err (!%p172_p0)
}
  0xdf   :  { %s176_s24 = scalar_lea.hbm %s267_s3, 16 }
  0xe0   :  { %p177_p1 = scmp.ne.s32.totalorder %s267_s3, %s176_s24  ;;  %p180_p2 = scmp.lt.u32.totalorder %s176_s24, %s267_s3 }
  0xe2   :  { %p182_p3 = pnand %p180_p2, %p177_p1 }
  0xe4   :  { %185 = shalt.err (!%p182_p3)
}
  0xe5   :  { %85 = dma.vmem_to_hbm [thread:$0]  %s83_s19, 16, %s267_s3, [#allocation4]  }
  0xe6   :  { %190 = dma.done.wait [#allocation4], 16  }
  0xe7   :  { %191 = vsyncadd [#allocation4], 4294967280 }
  0xe8   :  { %89 = vsyncpa [#allocation3], 1 }
  0xe9   :  { %90 = vsyncpa [#allocation6], 1 }
  0xea   :  { %91 = vsyncpa [#allocation4], 1 }

</bundles_post_ra>
